<compile_context>
chip_gen: v7x
topology: tpu7x:2x2x1
jax: 0.10.0
libtpu: 0.0.40
codegen_flags: <defaults>
</compile_context>

<pallas_src>
import numpy as np
import jax
import jax.numpy as jnp
from jax.experimental import pallas as pl
from jax.experimental.pallas import tpu as pltpu


def _round_up(x, m):
    return ((x + m - 1) // m) * m


def _choose_grid(B, target_lanes=8192):
    """Lane tiling: pad B to a 128 multiple, pick an (even, >=2 when possible)
    number of grid steps so both v7x TensorCores get work, and bound the pad
    waste to < 128 lanes per grid step (no round_up(B, tile_b) cliff)."""
    b128 = _round_up(max(B, 1), 128)
    ncols = b128 // 128
    if ncols <= 1:
        return 1, 128, 128
    g = max(2, -(-b128 // target_lanes))
    if g % 2:
        g += 1
    cols_per = -(-ncols // g)
    tile_b = cols_per * 128
    g = -(-b128 // tile_b)            # actual steps needed at this tile size
    if g % 2 and g > 1:
        g += 1                        # keep even for the two-TensorCore split
    return g, tile_b, g * tile_b


# ---------------------------------------------------------------------------
# Pallas kernel factory: only scalar constants (world spheres, weight) are
# baked into the trace; per-link vector constants arrive via tab_ref.
# ---------------------------------------------------------------------------
def make_collision_kernel(world_spheres_np, weight, n_spheres, n_world):
    wsph = [tuple(float(v) for v in world_spheres_np[w]) for w in range(n_world)]
    out_scale = float(weight) * 4.0          # the /0.25, folded into the weight

    def kernel(tab_ref, rot_ref, pos_ref, out_ref):
        # rot_ref: (9, NL, TB), pos_ref: (3, NL, TB), tab_ref: (NS*4, NL, 1)
        R00 = rot_ref[0]; R01 = rot_ref[1]; R02 = rot_ref[2]
        R10 = rot_ref[3]; R11 = rot_ref[4]; R12 = rot_ref[5]
        R20 = rot_ref[6]; R21 = rot_ref[7]; R22 = rot_ref[8]
        px = pos_ref[0]; py = pos_ref[1]; pz = pos_ref[2]

        pen = None
        for s in range(n_spheres):
            c = 4 * s
            ox = tab_ref[c + 0]               # (NL, 1), broadcast across lanes
            oy = tab_ref[c + 1]
            oz = tab_ref[c + 2]
            rr = tab_ref[c + 3]               # robot radius + distance_threshold

            # World-frame sphere centers for ALL links at once: R @ offset + p.
            wx = R00 * ox + R01 * oy + R02 * oz + px
            wy = R10 * ox + R11 * oy + R12 * oz + py
            wz = R20 * ox + R21 * oy + R22 * oz + pz

            m = None
            for w in range(n_world):
                cx, cy, cz, rw = wsph[w]
                dx = wx - cx
                dy = wy - cy
                dz = wz - cz
                dcen = jnp.sqrt(dx * dx + dy * dy + dz * dz)   # EUP slot
                val = rw - dcen
                m = val if m is None else jnp.maximum(m, val)
            pen_s = m + rr                                      # add (radius+thresh) once
            pen = pen_s if pen is None else jnp.maximum(pen, pen_s)

        d = jnp.clip(pen, 0.0, 0.2)                             # (NL, TB)
        total = jnp.sum(d, axis=0, keepdims=True)               # (1, TB), XLU
        out_ref[...] = out_scale * total

    return kernel


# ---------------------------------------------------------------------------
# Wrapper: layout plumbing + pallas_call
# ---------------------------------------------------------------------------
def primitive_collision_cost(link_pos_seq, link_rot_seq,
                             robot_spheres_np, world_spheres_np,
                             weight, distance_threshold=0.1, tile_b=None):
    batch, horizon, n_links, _ = link_pos_seq.shape
    B = batch * horizon
    NL = n_links
    NS = int(robot_spheres_np.shape[1])
    NW = int(world_spheres_np.shape[0])

    if tile_b is None:
        grid, tile_b, B_pad = _choose_grid(B)
    else:
        B_pad = _round_up(B, tile_b)
        grid = B_pad // tile_b
    pad = B_pad - B

    # Component-major pose slabs: links on sublanes, flattened batch*horizon on
    # lanes.  Two separate inputs (no concatenate materialization), no link pad.
    # TODO(synk): ideally the upstream FK producer would emit this layout
    # directly and skip the transpose/pad round trip entirely.
    rot_f = link_rot_seq.reshape(B, NL, 9).astype(jnp.float32).transpose(2, 1, 0)
    pos_f = link_pos_seq.reshape(B, NL, 3).astype(jnp.float32).transpose(2, 1, 0)
    if pad:
        rot_f = jnp.pad(rot_f, ((0, 0), (0, 0), (0, pad)))
        pos_f = jnp.pad(pos_f, ((0, 0), (0, 0), (0, pad)))

    # Per-link constant table (NS*4, NL, 1): sphere offsets + (radius+threshold).
    tab = np.array(robot_spheres_np, dtype=np.float32, copy=True)   # (NL, NS, 4)
    tab[..., 3] += float(distance_threshold)
    tab = np.transpose(tab, (1, 2, 0)).reshape(NS * 4, NL, 1)       # [4*s+k, l, 0]
    tab = jnp.asarray(tab)

    kernel = make_collision_kernel(world_spheres_np, weight, NS, NW)

    # Advisory cost estimate: ~ (18 rot + NW*10 dist/max + 2) flops per sphere
    # per (link, lane); one sqrt per (sphere, world, link, lane).
    flops = int(NS * (20 + NW * 10) * NL * B_pad)
    transcendentals = int(NS * NW * NL * B_pad)
    bytes_accessed = int(12 * NL * B_pad * 4 + B_pad * 4 + tab.size * 4)

    out = pl.pallas_call(
        kernel,
        out_shape=jax.ShapeDtypeStruct((1, B_pad), jnp.float32),
        grid=(grid,),
        in_specs=[
            pl.BlockSpec((NS * 4, NL, 1), lambda i: (0, 0, 0)),
            pl.BlockSpec((9, NL, tile_b), lambda i: (0, 0, i)),
            pl.BlockSpec((3, NL, tile_b), lambda i: (0, 0, i)),
        ],
        out_specs=pl.BlockSpec((1, tile_b), lambda i: (0, i)),
        compiler_params=pltpu.CompilerParams(
            dimension_semantics=("parallel",)),
        cost_estimate=pl.CostEstimate(
            flops=flops, transcendentals=transcendentals,
            bytes_accessed=bytes_accessed),
    )(tab, rot_f, pos_f)

    return out[0, :B].reshape(batch, horizon)


# ---------------------------------------------------------------------------
# Pure-JAX reference (for correctness check)
# ---------------------------------------------------------------------------
def reference_cost(link_pos_seq, link_rot_seq, robot_spheres, world_spheres,
                   weight, distance_threshold=0.1):
    batch, horizon, NL, _ = link_pos_seq.shape
    B = batch * horizon
    pos = link_pos_seq.reshape(B, NL, 3)
    rot = link_rot_seq.reshape(B, NL, 3, 3)
    centers = jnp.einsum('blij,lsj->blsi', rot, robot_spheres[..., :3]) + pos[:, :, None, :]
    rr = robot_spheres[..., 3]                    # (NL, NS)
    wc = world_spheres[:, :3]
    rw = world_spheres[:, 3]
    diff = centers[:, :, :, None, :] - wc[None, None, None, :, :]
    dcen = jnp.sqrt(jnp.sum(diff * diff, axis=-1))            # (B, NL, NS, NW)
    pen = rr[None, :, :, None] + rw[None, None, None, :] - dcen
    dist = jnp.max(pen, axis=(2, 3))                          # (B, NL)
    d = dist + distance_threshold
    d = jnp.clip(d, 0.0, 0.2) / 0.25
    cost = jnp.sum(d, axis=-1).reshape(batch, horizon)
    return weight * cost


if __name__ == "__main__":
    # Small shapes consistent with the module: (batch, horizon, n_links, 3)
    batch, horizon, n_links = 2, 8, 6
    n_spheres_per_link, n_world_objs = 2, 3
    weight = 5000.0
    distance_threshold = 0.1

    # Deterministic synthetic "robot collision spheres" (local offset xyz + radius)
    robot_spheres = np.array(
        [[[0.00, 0.00, 0.05, 0.06], [0.00, 0.00, 0.15, 0.05]],
         [[0.02, 0.00, 0.05, 0.06], [0.02, 0.00, 0.18, 0.05]],
         [[0.00, 0.03, 0.05, 0.05], [0.00, 0.03, 0.20, 0.04]],
         [[0.00, 0.00, 0.04, 0.05], [0.00, 0.00, 0.12, 0.04]],
         [[0.01, 0.01, 0.05, 0.04], [0.01, 0.01, 0.10, 0.04]],
         [[0.00, 0.00, 0.03, 0.04], [0.00, 0.00, 0.08, 0.03]]],
        dtype=np.float32)                                      # (NL, NS, 4)

    # Deterministic synthetic "world model" sphere primitives (center xyz + radius)
    # TODO(synk): STORM also supports cuboid world primitives / precomputed SDF grid;
    # only analytic sphere primitives are modeled here.
    world_spheres = np.array(
        [[0.40, 0.00, 0.30, 0.15],
         [-0.30, 0.35, 0.20, 0.10],
         [0.10, -0.40, 0.50, 0.20]],
        dtype=np.float32)                                      # (NW, 4)

    key = jax.random.PRNGKey(0)
    k_pos, k_rot = jax.random.split(key)
    link_pos_seq = 0.3 * jax.random.normal(
        k_pos, (batch, horizon, n_links, 3), dtype=jnp.float32)
    link_rot_seq = jax.random.orthogonal(
        k_rot, 3, shape=(batch, horizon, n_links), dtype=jnp.float32)

    cost = primitive_collision_cost(
        link_pos_seq, link_rot_seq, robot_spheres, world_spheres,
        weight, distance_threshold)
    cost = jax.block_until_ready(cost)

    ref = reference_cost(
        link_pos_seq, link_rot_seq,
        jnp.asarray(robot_spheres), jnp.asarray(world_spheres),
        weight, distance_threshold)
    ref = jax.block_until_ready(ref)

    assert cost.shape == (batch, horizon)
    np.testing.assert_allclose(np.asarray(cost), np.asarray(ref),
                               rtol=1e-5, atol=1e-3)
    print("KERNEL_OK")
</pallas_src>

<mosaic_0001>
module attributes {stable_mosaic.version = 11 : i64} {
  func.func @kernel(%arg0: i32, %arg1: memref<8x6x1xf32, #tpu.memory_space<vmem>>, %arg2: memref<9x6x128xf32, #tpu.memory_space<vmem>>, %arg3: memref<3x6x128xf32, #tpu.memory_space<vmem>>, %arg4: memref<1x128xf32, #tpu.memory_space<vmem>>) attributes {dimension_semantics = [#tpu.dimension_semantics<parallel>], iteration_bounds = array<i64: 1>, scalar_prefetch = 0 : i64, scratch_operands = 0 : i64, tpu.core_type = #tpu.core_type<tc>, window_params = [{pipeline_mode = #tpu.pipeline_mode<synchronous>, transform_indices = @transform_0, window_bounds = array<i64: 8, 6, 1>}, {transform_indices = @transform_1, window_bounds = array<i64: 9, 6, 128>}, {transform_indices = @transform_2, window_bounds = array<i64: 3, 6, 128>}, {transform_indices = @transform_3, window_bounds = array<i64: 1, 128>}]} {
    %c0 = arith.constant 0 : index
    %c0_0 = arith.constant 0 : index
    %c0_1 = arith.constant 0 : index
    %0 = vector.load %arg2[%c0, %c0_0, %c0_1] : memref<9x6x128xf32, #tpu.memory_space<vmem>>, vector<1x6x128xf32>
    %1 = vector.shape_cast %0 : vector<1x6x128xf32> to vector<6x128xf32>
    %c1 = arith.constant 1 : index
    %c0_2 = arith.constant 0 : index
    %c0_3 = arith.constant 0 : index
    %2 = vector.load %arg2[%c1, %c0_2, %c0_3] : memref<9x6x128xf32, #tpu.memory_space<vmem>>, vector<1x6x128xf32>
    %3 = vector.shape_cast %2 : vector<1x6x128xf32> to vector<6x128xf32>
    %c2 = arith.constant 2 : index
    %c0_4 = arith.constant 0 : index
    %c0_5 = arith.constant 0 : index
    %4 = vector.load %arg2[%c2, %c0_4, %c0_5] : memref<9x6x128xf32, #tpu.memory_space<vmem>>, vector<1x6x128xf32>
    %5 = vector.shape_cast %4 : vector<1x6x128xf32> to vector<6x128xf32>
    %c3 = arith.constant 3 : index
    %c0_6 = arith.constant 0 : index
    %c0_7 = arith.constant 0 : index
    %6 = vector.load %arg2[%c3, %c0_6, %c0_7] : memref<9x6x128xf32, #tpu.memory_space<vmem>>, vector<1x6x128xf32>
    %7 = vector.shape_cast %6 : vector<1x6x128xf32> to vector<6x128xf32>
    %c4 = arith.constant 4 : index
    %c0_8 = arith.constant 0 : index
    %c0_9 = arith.constant 0 : index
    %8 = vector.load %arg2[%c4, %c0_8, %c0_9] : memref<9x6x128xf32, #tpu.memory_space<vmem>>, vector<1x6x128xf32>
    %9 = vector.shape_cast %8 : vector<1x6x128xf32> to vector<6x128xf32>
    %c5 = arith.constant 5 : index
    %c0_10 = arith.constant 0 : index
    %c0_11 = arith.constant 0 : index
    %10 = vector.load %arg2[%c5, %c0_10, %c0_11] : memref<9x6x128xf32, #tpu.memory_space<vmem>>, vector<1x6x128xf32>
    %11 = vector.shape_cast %10 : vector<1x6x128xf32> to vector<6x128xf32>
    %c6 = arith.constant 6 : index
    %c0_12 = arith.constant 0 : index
    %c0_13 = arith.constant 0 : index
    %12 = vector.load %arg2[%c6, %c0_12, %c0_13] : memref<9x6x128xf32, #tpu.memory_space<vmem>>, vector<1x6x128xf32>
    %13 = vector.shape_cast %12 : vector<1x6x128xf32> to vector<6x128xf32>
    %c7 = arith.constant 7 : index
    %c0_14 = arith.constant 0 : index
    %c0_15 = arith.constant 0 : index
    %14 = vector.load %arg2[%c7, %c0_14, %c0_15] : memref<9x6x128xf32, #tpu.memory_space<vmem>>, vector<1x6x128xf32>
    %15 = vector.shape_cast %14 : vector<1x6x128xf32> to vector<6x128xf32>
    %c8 = arith.constant 8 : index
    %c0_16 = arith.constant 0 : index
    %c0_17 = arith.constant 0 : index
    %16 = vector.load %arg2[%c8, %c0_16, %c0_17] : memref<9x6x128xf32, #tpu.memory_space<vmem>>, vector<1x6x128xf32>
    %17 = vector.shape_cast %16 : vector<1x6x128xf32> to vector<6x128xf32>
    %c0_18 = arith.constant 0 : index
    %c0_19 = arith.constant 0 : index
    %c0_20 = arith.constant 0 : index
    %18 = vector.load %arg3[%c0_18, %c0_19, %c0_20] : memref<3x6x128xf32, #tpu.memory_space<vmem>>, vector<1x6x128xf32>
    %19 = vector.shape_cast %18 : vector<1x6x128xf32> to vector<6x128xf32>
    %c1_21 = arith.constant 1 : index
    %c0_22 = arith.constant 0 : index
    %c0_23 = arith.constant 0 : index
    %20 = vector.load %arg3[%c1_21, %c0_22, %c0_23] : memref<3x6x128xf32, #tpu.memory_space<vmem>>, vector<1x6x128xf32>
    %21 = vector.shape_cast %20 : vector<1x6x128xf32> to vector<6x128xf32>
    %c2_24 = arith.constant 2 : index
    %c0_25 = arith.constant 0 : index
    %c0_26 = arith.constant 0 : index
    %22 = vector.load %arg3[%c2_24, %c0_25, %c0_26] : memref<3x6x128xf32, #tpu.memory_space<vmem>>, vector<1x6x128xf32>
    %23 = vector.shape_cast %22 : vector<1x6x128xf32> to vector<6x128xf32>
    %c0_27 = arith.constant 0 : index
    %c0_28 = arith.constant 0 : index
    %c0_29 = arith.constant 0 : index
    %24 = vector.load %arg1[%c0_27, %c0_28, %c0_29] : memref<8x6x1xf32, #tpu.memory_space<vmem>>, vector<1x6x1xf32>
    %25 = vector.shape_cast %24 : vector<1x6x1xf32> to vector<6x1xf32>
    %c1_30 = arith.constant 1 : index
    %c0_31 = arith.constant 0 : index
    %c0_32 = arith.constant 0 : index
    %26 = vector.load %arg1[%c1_30, %c0_31, %c0_32] : memref<8x6x1xf32, #tpu.memory_space<vmem>>, vector<1x6x1xf32>
    %27 = vector.shape_cast %26 : vector<1x6x1xf32> to vector<6x1xf32>
    %c2_33 = arith.constant 2 : index
    %c0_34 = arith.constant 0 : index
    %c0_35 = arith.constant 0 : index
    %28 = vector.load %arg1[%c2_33, %c0_34, %c0_35] : memref<8x6x1xf32, #tpu.memory_space<vmem>>, vector<1x6x1xf32>
    %29 = vector.shape_cast %28 : vector<1x6x1xf32> to vector<6x1xf32>
    %c3_36 = arith.constant 3 : index
    %c0_37 = arith.constant 0 : index
    %c0_38 = arith.constant 0 : index
    %30 = vector.load %arg1[%c3_36, %c0_37, %c0_38] : memref<8x6x1xf32, #tpu.memory_space<vmem>>, vector<1x6x1xf32>
    %31 = vector.shape_cast %30 : vector<1x6x1xf32> to vector<6x1xf32>
    %32 = vector.broadcast %25 : vector<6x1xf32> to vector<6x128xf32>
    %33 = arith.mulf %1, %32 : vector<6x128xf32>
    %34 = vector.broadcast %27 : vector<6x1xf32> to vector<6x128xf32>
    %35 = arith.mulf %3, %34 : vector<6x128xf32>
    %36 = arith.addf %33, %35 : vector<6x128xf32>
    %37 = vector.broadcast %29 : vector<6x1xf32> to vector<6x128xf32>
    %38 = arith.mulf %5, %37 : vector<6x128xf32>
    %39 = arith.addf %36, %38 : vector<6x128xf32>
    %40 = arith.addf %39, %19 : vector<6x128xf32>
    %41 = vector.broadcast %25 : vector<6x1xf32> to vector<6x128xf32>
    %42 = arith.mulf %7, %41 : vector<6x128xf32>
    %43 = vector.broadcast %27 : vector<6x1xf32> to vector<6x128xf32>
    %44 = arith.mulf %9, %43 : vector<6x128xf32>
    %45 = arith.addf %42, %44 : vector<6x128xf32>
    %46 = vector.broadcast %29 : vector<6x1xf32> to vector<6x128xf32>
    %47 = arith.mulf %11, %46 : vector<6x128xf32>
    %48 = arith.addf %45, %47 : vector<6x128xf32>
    %49 = arith.addf %48, %21 : vector<6x128xf32>
    %50 = vector.broadcast %25 : vector<6x1xf32> to vector<6x128xf32>
    %51 = arith.mulf %13, %50 : vector<6x128xf32>
    %52 = vector.broadcast %27 : vector<6x1xf32> to vector<6x128xf32>
    %53 = arith.mulf %15, %52 : vector<6x128xf32>
    %54 = arith.addf %51, %53 : vector<6x128xf32>
    %55 = vector.broadcast %29 : vector<6x1xf32> to vector<6x128xf32>
    %56 = arith.mulf %17, %55 : vector<6x128xf32>
    %57 = arith.addf %54, %56 : vector<6x128xf32>
    %58 = arith.addf %57, %23 : vector<6x128xf32>
    %cst = arith.constant 4.000000e-01 : f32
    %59 = vector.broadcast %cst : f32 to vector<6x128xf32>
    %60 = arith.subf %40, %59 : vector<6x128xf32>
    %cst_39 = arith.constant 0.000000e+00 : f32
    %61 = vector.broadcast %cst_39 : f32 to vector<6x128xf32>
    %62 = arith.subf %49, %61 : vector<6x128xf32>
    %cst_40 = arith.constant 3.000000e-01 : f32
    %63 = vector.broadcast %cst_40 : f32 to vector<6x128xf32>
    %64 = arith.subf %58, %63 : vector<6x128xf32>
    %65 = arith.mulf %60, %60 : vector<6x128xf32>
    %66 = arith.mulf %62, %62 : vector<6x128xf32>
    %67 = arith.addf %65, %66 : vector<6x128xf32>
    %68 = arith.mulf %64, %64 : vector<6x128xf32>
    %69 = arith.addf %67, %68 : vector<6x128xf32>
    %70 = math.sqrt %69 : vector<6x128xf32>
    %cst_41 = arith.constant 1.500000e-01 : f32
    %71 = vector.broadcast %cst_41 : f32 to vector<6x128xf32>
    %72 = arith.subf %71, %70 : vector<6x128xf32>
    %cst_42 = arith.constant -3.000000e-01 : f32
    %73 = vector.broadcast %cst_42 : f32 to vector<6x128xf32>
    %74 = arith.subf %40, %73 : vector<6x128xf32>
    %cst_43 = arith.constant 3.500000e-01 : f32
    %75 = vector.broadcast %cst_43 : f32 to vector<6x128xf32>
    %76 = arith.subf %49, %75 : vector<6x128xf32>
    %cst_44 = arith.constant 2.000000e-01 : f32
    %77 = vector.broadcast %cst_44 : f32 to vector<6x128xf32>
    %78 = arith.subf %58, %77 : vector<6x128xf32>
    %79 = arith.mulf %74, %74 : vector<6x128xf32>
    %80 = arith.mulf %76, %76 : vector<6x128xf32>
    %81 = arith.addf %79, %80 : vector<6x128xf32>
    %82 = arith.mulf %78, %78 : vector<6x128xf32>
    %83 = arith.addf %81, %82 : vector<6x128xf32>
    %84 = math.sqrt %83 : vector<6x128xf32>
    %cst_45 = arith.constant 1.000000e-01 : f32
    %85 = vector.broadcast %cst_45 : f32 to vector<6x128xf32>
    %86 = arith.subf %85, %84 : vector<6x128xf32>
    %87 = arith.maximumf %72, %86 : vector<6x128xf32>
    %cst_46 = arith.constant 1.000000e-01 : f32
    %88 = vector.broadcast %cst_46 : f32 to vector<6x128xf32>
    %89 = arith.subf %40, %88 : vector<6x128xf32>
    %cst_47 = arith.constant -4.000000e-01 : f32
    %90 = vector.broadcast %cst_47 : f32 to vector<6x128xf32>
    %91 = arith.subf %49, %90 : vector<6x128xf32>
    %cst_48 = arith.constant 5.000000e-01 : f32
    %92 = vector.broadcast %cst_48 : f32 to vector<6x128xf32>
    %93 = arith.subf %58, %92 : vector<6x128xf32>
    %94 = arith.mulf %89, %89 : vector<6x128xf32>
    %95 = arith.mulf %91, %91 : vector<6x128xf32>
    %96 = arith.addf %94, %95 : vector<6x128xf32>
    %97 = arith.mulf %93, %93 : vector<6x128xf32>
    %98 = arith.addf %96, %97 : vector<6x128xf32>
    %99 = math.sqrt %98 : vector<6x128xf32>
    %cst_49 = arith.constant 2.000000e-01 : f32
    %100 = vector.broadcast %cst_49 : f32 to vector<6x128xf32>
    %101 = arith.subf %100, %99 : vector<6x128xf32>
    %102 = arith.maximumf %87, %101 : vector<6x128xf32>
    %103 = vector.broadcast %31 : vector<6x1xf32> to vector<6x128xf32>
    %104 = arith.addf %102, %103 : vector<6x128xf32>
    %c4_50 = arith.constant 4 : index
    %c0_51 = arith.constant 0 : index
    %c0_52 = arith.constant 0 : index
    %105 = vector.load %arg1[%c4_50, %c0_51, %c0_52] : memref<8x6x1xf32, #tpu.memory_space<vmem>>, vector<1x6x1xf32>
    %106 = vector.shape_cast %105 : vector<1x6x1xf32> to vector<6x1xf32>
    %c5_53 = arith.constant 5 : index
    %c0_54 = arith.constant 0 : index
    %c0_55 = arith.constant 0 : index
    %107 = vector.load %arg1[%c5_53, %c0_54, %c0_55] : memref<8x6x1xf32, #tpu.memory_space<vmem>>, vector<1x6x1xf32>
    %108 = vector.shape_cast %107 : vector<1x6x1xf32> to vector<6x1xf32>
    %c6_56 = arith.constant 6 : index
    %c0_57 = arith.constant 0 : index
    %c0_58 = arith.constant 0 : index
    %109 = vector.load %arg1[%c6_56, %c0_57, %c0_58] : memref<8x6x1xf32, #tpu.memory_space<vmem>>, vector<1x6x1xf32>
    %110 = vector.shape_cast %109 : vector<1x6x1xf32> to vector<6x1xf32>
    %c7_59 = arith.constant 7 : index
    %c0_60 = arith.constant 0 : index
    %c0_61 = arith.constant 0 : index
    %111 = vector.load %arg1[%c7_59, %c0_60, %c0_61] : memref<8x6x1xf32, #tpu.memory_space<vmem>>, vector<1x6x1xf32>
    %112 = vector.shape_cast %111 : vector<1x6x1xf32> to vector<6x1xf32>
    %113 = vector.broadcast %106 : vector<6x1xf32> to vector<6x128xf32>
    %114 = arith.mulf %1, %113 : vector<6x128xf32>
    %115 = vector.broadcast %108 : vector<6x1xf32> to vector<6x128xf32>
    %116 = arith.mulf %3, %115 : vector<6x128xf32>
    %117 = arith.addf %114, %116 : vector<6x128xf32>
    %118 = vector.broadcast %110 : vector<6x1xf32> to vector<6x128xf32>
    %119 = arith.mulf %5, %118 : vector<6x128xf32>
    %120 = arith.addf %117, %119 : vector<6x128xf32>
    %121 = arith.addf %120, %19 : vector<6x128xf32>
    %122 = vector.broadcast %106 : vector<6x1xf32> to vector<6x128xf32>
    %123 = arith.mulf %7, %122 : vector<6x128xf32>
    %124 = vector.broadcast %108 : vector<6x1xf32> to vector<6x128xf32>
    %125 = arith.mulf %9, %124 : vector<6x128xf32>
    %126 = arith.addf %123, %125 : vector<6x128xf32>
    %127 = vector.broadcast %110 : vector<6x1xf32> to vector<6x128xf32>
    %128 = arith.mulf %11, %127 : vector<6x128xf32>
    %129 = arith.addf %126, %128 : vector<6x128xf32>
    %130 = arith.addf %129, %21 : vector<6x128xf32>
    %131 = vector.broadcast %106 : vector<6x1xf32> to vector<6x128xf32>
    %132 = arith.mulf %13, %131 : vector<6x128xf32>
    %133 = vector.broadcast %108 : vector<6x1xf32> to vector<6x128xf32>
    %134 = arith.mulf %15, %133 : vector<6x128xf32>
    %135 = arith.addf %132, %134 : vector<6x128xf32>
    %136 = vector.broadcast %110 : vector<6x1xf32> to vector<6x128xf32>
    %137 = arith.mulf %17, %136 : vector<6x128xf32>
    %138 = arith.addf %135, %137 : vector<6x128xf32>
    %139 = arith.addf %138, %23 : vector<6x128xf32>
    %cst_62 = arith.constant 4.000000e-01 : f32
    %140 = vector.broadcast %cst_62 : f32 to vector<6x128xf32>
    %141 = arith.subf %121, %140 : vector<6x128xf32>
    %cst_63 = arith.constant 0.000000e+00 : f32
    %142 = vector.broadcast %cst_63 : f32 to vector<6x128xf32>
    %143 = arith.subf %130, %142 : vector<6x128xf32>
    %cst_64 = arith.constant 3.000000e-01 : f32
    %144 = vector.broadcast %cst_64 : f32 to vector<6x128xf32>
    %145 = arith.subf %139, %144 : vector<6x128xf32>
    %146 = arith.mulf %141, %141 : vector<6x128xf32>
    %147 = arith.mulf %143, %143 : vector<6x128xf32>
    %148 = arith.addf %146, %147 : vector<6x128xf32>
    %149 = arith.mulf %145, %145 : vector<6x128xf32>
    %150 = arith.addf %148, %149 : vector<6x128xf32>
    %151 = math.sqrt %150 : vector<6x128xf32>
    %cst_65 = arith.constant 1.500000e-01 : f32
    %152 = vector.broadcast %cst_65 : f32 to vector<6x128xf32>
    %153 = arith.subf %152, %151 : vector<6x128xf32>
    %cst_66 = arith.constant -3.000000e-01 : f32
    %154 = vector.broadcast %cst_66 : f32 to vector<6x128xf32>
    %155 = arith.subf %121, %154 : vector<6x128xf32>
    %cst_67 = arith.constant 3.500000e-01 : f32
    %156 = vector.broadcast %cst_67 : f32 to vector<6x128xf32>
    %157 = arith.subf %130, %156 : vector<6x128xf32>
    %cst_68 = arith.constant 2.000000e-01 : f32
    %158 = vector.broadcast %cst_68 : f32 to vector<6x128xf32>
    %159 = arith.subf %139, %158 : vector<6x128xf32>
    %160 = arith.mulf %155, %155 : vector<6x128xf32>
    %161 = arith.mulf %157, %157 : vector<6x128xf32>
    %162 = arith.addf %160, %161 : vector<6x128xf32>
    %163 = arith.mulf %159, %159 : vector<6x128xf32>
    %164 = arith.addf %162, %163 : vector<6x128xf32>
    %165 = math.sqrt %164 : vector<6x128xf32>
    %cst_69 = arith.constant 1.000000e-01 : f32
    %166 = vector.broadcast %cst_69 : f32 to vector<6x128xf32>
    %167 = arith.subf %166, %165 : vector<6x128xf32>
    %168 = arith.maximumf %153, %167 : vector<6x128xf32>
    %cst_70 = arith.constant 1.000000e-01 : f32
    %169 = vector.broadcast %cst_70 : f32 to vector<6x128xf32>
    %170 = arith.subf %121, %169 : vector<6x128xf32>
    %cst_71 = arith.constant -4.000000e-01 : f32
    %171 = vector.broadcast %cst_71 : f32 to vector<6x128xf32>
    %172 = arith.subf %130, %171 : vector<6x128xf32>
    %cst_72 = arith.constant 5.000000e-01 : f32
    %173 = vector.broadcast %cst_72 : f32 to vector<6x128xf32>
    %174 = arith.subf %139, %173 : vector<6x128xf32>
    %175 = arith.mulf %170, %170 : vector<6x128xf32>
    %176 = arith.mulf %172, %172 : vector<6x128xf32>
    %177 = arith.addf %175, %176 : vector<6x128xf32>
    %178 = arith.mulf %174, %174 : vector<6x128xf32>
    %179 = arith.addf %177, %178 : vector<6x128xf32>
    %180 = math.sqrt %179 : vector<6x128xf32>
    %cst_73 = arith.constant 2.000000e-01 : f32
    %181 = vector.broadcast %cst_73 : f32 to vector<6x128xf32>
    %182 = arith.subf %181, %180 : vector<6x128xf32>
    %183 = arith.maximumf %168, %182 : vector<6x128xf32>
    %184 = vector.broadcast %112 : vector<6x1xf32> to vector<6x128xf32>
    %185 = arith.addf %183, %184 : vector<6x128xf32>
    %186 = arith.maximumf %104, %185 : vector<6x128xf32>
    %cst_74 = arith.constant 0.000000e+00 : f32
    %cst_75 = arith.constant 2.000000e-01 : f32
    %187 = vector.broadcast %cst_74 : f32 to vector<6x128xf32>
    %188 = arith.maximumf %187, %186 : vector<6x128xf32>
    %189 = vector.broadcast %cst_75 : f32 to vector<6x128xf32>
    %190 = arith.minimumf %189, %188 : vector<6x128xf32>
    %cst_76 = arith.constant dense<0.000000e+00> : vector<128xf32>
    %191 = vector.multi_reduction <add>, %190, %cst_76 [0] : vector<6x128xf32> to vector<128xf32>
    %192 = vector.shape_cast %191 : vector<128xf32> to vector<1x128xf32>
    %cst_77 = arith.constant 2.000000e+04 : f32
    %193 = vector.broadcast %cst_77 : f32 to vector<1x128xf32>
    %194 = arith.mulf %193, %192 : vector<1x128xf32>
    %c0_78 = arith.constant 0 : index
    %c0_79 = arith.constant 0 : index
    %195 = vector.load %arg4[%c0_78, %c0_79] : memref<1x128xf32, #tpu.memory_space<vmem>>, vector<1x128xf32>
    tpu.vector_store %arg4[%c0_78, %c0_79], %194 {strides = array<i32>} : memref<1x128xf32, #tpu.memory_space<vmem>>, vector<1x128xf32>,
    return
  }
  func.func @transform_0(%arg0: i32) -> (i32, i32, i32) {
    %c0_i32 = arith.constant 0 : i32
    %c0_i32_0 = arith.constant 0 : i32
    %c0_i32_1 = arith.constant 0 : i32
    %c0_i32_2 = arith.constant 0 : i32
    return %c0_i32, %c0_i32_0, %c0_i32_1 : i32, i32, i32
  }
  func.func @transform_1(%arg0: i32) -> (i32, i32, i32) {
    %c0_i32 = arith.constant 0 : i32
    %c0_i32_0 = arith.constant 0 : i32
    %c0_i32_1 = arith.constant 0 : i32
    return %c0_i32, %c0_i32_0, %arg0 : i32, i32, i32
  }
  func.func @transform_2(%arg0: i32) -> (i32, i32, i32) {
    %c0_i32 = arith.constant 0 : i32
    %c0_i32_0 = arith.constant 0 : i32
    %c0_i32_1 = arith.constant 0 : i32
    return %c0_i32, %c0_i32_0, %arg0 : i32, i32, i32
  }
  func.func @transform_3(%arg0: i32) -> (i32, i32) {
    %c0_i32 = arith.constant 0 : i32
    %c0_i32_0 = arith.constant 0 : i32
    return %c0_i32, %arg0 : i32, i32
  }
}

</mosaic_0001>

<bundles_post_ra>
// kernel: tpu_custom_call.1
= control target key start
LH: loop header
LB: loop body
LE: loop exit
PB: predicated region body
PF: predicated region fallthrough
CT: control target
= control target key end

     0   :  { %8 = vsyncpa [#allocation3], 0  ;;  %s477_s0 = inlined_call_operand.vmem [shape: f32[8,6,1], index: 0, kind: input, shape index: {}]   ;;  %s478_s1 = inlined_call_operand.vmem [shape: f32[9,6,128], index: 1, kind: input, shape index: {}]   ;;  %s479_s2 = inlined_call_operand.hbm [shape: f32[3,6,128], index: 2, kind: input, shape index: {}]   ;;  %s480_s3 = inlined_call_operand.hbm [shape: f32[1,128], index: 3, kind: output, shape index: {}]  }
   0x1   :  { %9 = vsyncpa [#allocation4], 0  ;;  %s368_s12 = smov [#allocation2]   ;;  %s320_s16 = scalar_lea.hbm %s479_s2, 384 }
   0x2   :  { %s19_s13 = sshll.u32 %s368_s12, 4  ;;  %p321_p0 = scmp.ne.s32.totalorder %s479_s2, %s320_s16  ;;  %s20_s13 = int_to_ptr.vmem [resolvable:$true] %s19_s13 }
   0x3   :  { %p324_p1 = scmp.lt.u32.totalorder %s320_s16, %s479_s2 }
   0x5   :  { %p326_p2 = pnand %p324_p1, %p321_p0 }
   0x7   :  { %329 = shalt.err (!%p326_p2)
}
   0x8   :  { %s330_s21 = scalar_lea.vmem %s20_s13, 384  ;;  %p335_p4 = scmp.lt.s32.totalorder %s20_s13, %s20_s13 }
   0x9   :  { %p331_p3 = scmp.ne.s32.totalorder %s20_s13, %s330_s21  ;;  %p336_p5 = scmp.lt.s32.totalorder %s330_s21, %s330_s21 }
   0xb   :  { %p337_p6 = por %p336_p5, %p335_p4 }
   0xd   :  { %p338_p7 = pnand %p337_p6, %p331_p3 }
   0xf   :  { %341 = shalt.err (!%p338_p7)
}
  0x10   :  { %s369_s22 = smov 128   ;;  %s370_s23 = smov 8  }
  0x11   :  { %25 = dma.hbm_to_vmem [thread:$0]  %s479_s2, 384, %s20_s13, [#allocation3], %s369_s22, %s369_s22, %s370_s23  }
  0x12   :  { %364 = dma.done.wait [#allocation3], 384  }
  0x13   :  { %365 = vsyncadd [#allocation3], 4294966912  ;;  %v371_v0 = vmov 0   ;;  %v289_v1 = vld [vmem:[%s477_s0 + $0x20] sm:$0x3f]  ;;  %vm245_vm12 = vcmask 1045504  }
  0x14   :  { %307 = vset.pattern.permute.xlu1 %v371_v0  ;;  %306 = vset.pattern.permute.xlu0 %v371_v0  ;;  %v51_v2 = vld [vmem:[%s477_s0] sm:$0x3f]  ;;  %v290_v3 = vld [vmem:[%s477_s0 + $0x28] sm:$0x3f]  ;;  %v291_v5 = vld [vmem:[%s477_s0 + $0x30] sm:$0x3f] }
  0x15   :  { %156 = vperm.xlu1 %307, %v289_v1   ;;  %60 = vperm.xlu0 %306, %v51_v2   ;;  %v278_v4 = vld [vmem:[%s477_s0 + $0x8] sm:$0x3f]  ;;  %v279_v6 = vld [vmem:[%s477_s0 + $0x10] sm:$0x3f]  ;;  %v292_v7 = vld [vmem:[%s477_s0 + $0x38] sm:$0x3f] }
  0x16   :  { %v280_v8 = vld [vmem:[%s477_s0 + $0x18] sm:$0x3f]  ;;  %v29_v11 = vld [vmem:[%s478_s1] sm:$0x3f]  ;;  %v270_v13 = vld [vmem:[%s478_s1 + $0x8] sm:$0x3f] }
  0x17   :  { %v272_v12 = vld [vmem:[%s478_s1 + $0x18] sm:$0x3f]  ;;  %v273_v14 = vld [vmem:[%s478_s1 + $0x20] sm:$0x3f]  ;;  %v275_v16 = vld [vmem:[%s478_s1 + $0x30] sm:$0x3f] }
  0x18   :  { %v276_v15 = vld [vmem:[%s478_s1 + $0x38] sm:$0x3f]  ;;  %v271_v29 = vld [vmem:[%s478_s1 + $0x10] sm:$0x3f]  ;;  %v274_v30 = vld [vmem:[%s478_s1 + $0x28] sm:$0x3f] }
  0x19   :  { %162 = vperm.xlu1 %307, %v290_v3   ;;  %66 = vperm.xlu0 %306, %v278_v4   ;;  %v277_v31 = vld [vmem:[%s478_s1 + $0x40] sm:$0x3f]  ;;  %v46_v46 = vld [vmem:[#allocation2] sm:$0x3f]  ;;  %v48_v47 = vld [vmem:[#allocation2 + $0x8] sm:$0x3f] }
  0x1a   :  { %v50_v48 = vld [vmem:[#allocation2 + $0x10] sm:$0x3f]  ;;  %s372_s1 = smov [#allocation5]  }
  0x1b   :  { %s261_s4 = sshll.u32 %s372_s1, 4  ;;  %s262_s4 = int_to_ptr.vmem [resolvable:$true] %s261_s4 }
  0x1c   :  { %s342_s2 = scalar_lea.vmem %s262_s4, 16  ;;  %s346_s5 = scalar_lea.vmem %s262_s4, 32 }
  0x1d   :  { %169 = vperm.xlu1 %307, %v291_v5   ;;  %73 = vperm.xlu0 %306, %v279_v6   ;;  %p343_p8 = scmp.ne.s32.totalorder %s262_s4, %s342_s2  ;;  %p347_p9 = scmp.lt.s32.totalorder %s262_s4, %s262_s4 }
  0x1e   :  { %p348_p10 = scmp.lt.s32.totalorder %s346_s5, %s342_s2 }
  0x20   :  { %p349_p11 = por %p348_p10, %p347_p9 }
  0x21   :  { %238 = vperm.xlu1 %307, %v292_v7   ;;  %142 = vperm.xlu0 %306, %v280_v8  }
  0x22   :  { %p350_p12 = pnand %p349_p11, %p343_p8 }
  0x94   :  { %v157_v9 = vpop.permute.xlu1 %156  ;;  %v61_v10 = vpop.permute.xlu0 %60 }
  0x95   :  { %v159_v17 = vmul.f32 %v157_v9, %v29_v11  ;;  %v175_v18 = vmul.f32 %v272_v12, %v157_v9  ;;  %v181_v25 = vmul.f32 %v275_v16, %v157_v9  ;;  %v63_v26 = vmul.f32 %v61_v10, %v29_v11 }
  0x96   :  { %v79_v32 = vmul.f32 %v272_v12, %v61_v10  ;;  %v85_v33 = vmul.f32 %v275_v16, %v61_v10 }
  0x98   :  { %v163_v19 = vpop.permute.xlu1 %162  ;;  %v67_v20 = vpop.permute.xlu0 %66 }
  0x99   :  { %v165_v21 = vmul.f32 %v270_v13, %v163_v19  ;;  %v176_v22 = vmul.f32 %v273_v14, %v163_v19  ;;  %v182_v23 = vmul.f32 %v276_v15, %v163_v19  ;;  %v69_v24 = vmul.f32 %v270_v13, %v67_v20 }
  0x9a   :  { %v80_v27 = vmul.f32 %v273_v14, %v67_v20  ;;  %v86_v28 = vmul.f32 %v276_v15, %v67_v20 }
  0x9b   :  { %v166_v34 = vadd.f32 %v165_v21, %v159_v17  ;;  %v177_v35 = vadd.f32 %v176_v22, %v175_v18  ;;  %v183_v36 = vadd.f32 %v182_v23, %v181_v25  ;;  %v70_v37 = vadd.f32 %v69_v24, %v63_v26 }
  0x9c   :  { %v170_v38 = vpop.permute.xlu1 %169  ;;  %v74_v39 = vpop.permute.xlu0 %73  ;;  %v81_v44 = vadd.f32 %v80_v27, %v79_v32  ;;  %v87_v45 = vadd.f32 %v86_v28, %v85_v33 }
  0x9d   :  { %v172_v40 = vmul.f32 %v271_v29, %v170_v38  ;;  %v178_v41 = vmul.f32 %v274_v30, %v170_v38  ;;  %v184_v42 = vmul.f32 %v277_v31, %v170_v38  ;;  %v76_v43 = vmul.f32 %v271_v29, %v74_v39 }
  0x9e   :  { %v82_v49 = vmul.f32 %v274_v30, %v74_v39  ;;  %v88_v50 = vmul.f32 %v277_v31, %v74_v39 }
  0x9f   :  { %v173_v51 = vadd.f32 %v172_v40, %v166_v34  ;;  %v179_v52 = vadd.f32 %v178_v41, %v177_v35  ;;  %v185_v53 = vadd.f32 %v184_v42, %v183_v36  ;;  %v77_v54 = vadd.f32 %v76_v43, %v70_v37 }
  0xa0   :  { %v83_v55 = vadd.f32 %v82_v49, %v81_v44  ;;  %v89_v56 = vadd.f32 %v88_v50, %v87_v45 }
  0xa1   :  { %v174_v57 = vadd.f32 %v173_v51, %v46_v46  ;;  %v180_v58 = vadd.f32 %v179_v52, %v48_v47  ;;  %v186_v59 = vadd.f32 %v185_v53, %v50_v48  ;;  %v78_v60 = vadd.f32 %v77_v54, %v46_v46 }
  0xa2   :  { %v84_v61 = vadd.f32 %v83_v55, %v48_v47  ;;  %v90_v62 = vadd.f32 %v89_v56, %v50_v48 }
  0xa3   :  { %v293_v63 = vadd.f32 -0.4, %v174_v57  ;;  %v294_v0 = vadd.f32 -0.3, %v186_v59  ;;  %v190_v1 = vmul.f32 %v180_v58, %v180_v58  ;;  %v295_v2 = vadd.f32 0.3, %v174_v57 }
  0xa4   :  { %v296_v3 = vadd.f32 -0.35, %v180_v58  ;;  %v297_v4 = vadd.f32 -0.2, %v186_v59  ;;  %v298_v5 = vadd.f32 -0.1, %v174_v57  ;;  %v94_v6 = vmul.f32 %v84_v61, %v84_v61 }
  0xa5   :  { %v189_v7 = vmul.f32 %v293_v63, %v293_v63  ;;  %v192_v8 = vmul.f32 %v294_v0, %v294_v0  ;;  %v205_v9 = vmul.f32 %v295_v2, %v295_v2  ;;  %v299_v10 = vadd.f32 0.4, %v180_v58 }
  0xa6   :  { %v206_v11 = vmul.f32 %v296_v3, %v296_v3  ;;  %v208_v12 = vmul.f32 %v297_v4, %v297_v4  ;;  %v300_v13 = vadd.f32 -0.5, %v186_v59  ;;  %v222_v14 = vmul.f32 %v298_v5, %v298_v5 }
  0xa7   :  { %v191_v15 = vadd.f32 %v190_v1, %v189_v7  ;;  %v223_v16 = vmul.f32 %v299_v10, %v299_v10  ;;  %v281_v17 = vadd.f32 -0.4, %v78_v60  ;;  %v282_v18 = vadd.f32 -0.3, %v90_v62 }
  0xa8   :  { %v207_v19 = vadd.f32 %v206_v11, %v205_v9  ;;  %v225_v20 = vmul.f32 %v300_v13, %v300_v13  ;;  %v283_v21 = vadd.f32 0.3, %v78_v60  ;;  %v284_v22 = vadd.f32 -0.35, %v84_v61 }
  0xa9   :  { %v193_v23 = vadd.f32 %v192_v8, %v191_v15  ;;  %v224_v24 = vadd.f32 %v223_v16, %v222_v14  ;;  %v93_v25 = vmul.f32 %v281_v17, %v281_v17  ;;  %v96_v26 = vmul.f32 %v282_v18, %v282_v18 }
  0xaa   :  { %v209_v27 = vadd.f32 %v208_v12, %v207_v19  ;;  %v285_v28 = vadd.f32 -0.2, %v90_v62  ;;  %v109_v29 = vmul.f32 %v283_v21, %v283_v21  ;;  %v110_v30 = vmul.f32 %v284_v22, %v284_v22 }
  0xab   :  { %v226_v31 = vadd.f32 %v225_v20, %v224_v24  ;;  %v95_v32 = vadd.f32 %v94_v6, %v93_v25  ;;  %v286_v33 = vadd.f32 -0.1, %v78_v60  ;;  %v287_v34 = vadd.f32 0.4, %v84_v61  ;;  %v239_v20 = vpop.permute.xlu1 %238 }
  0xac   :  { %v111_v35 = vadd.f32 %v110_v30, %v109_v29  ;;  %v112_v36 = vmul.f32 %v285_v28, %v285_v28  ;;  %v288_v37 = vadd.f32 -0.5, %v90_v62  ;;  %308 = vrsqrt.f32 %v193_v23 }
  0xad   :  { %v97_v38 = vadd.f32 %v96_v26, %v95_v32  ;;  %v126_v39 = vmul.f32 %v286_v33, %v286_v33  ;;  %v127_v40 = vmul.f32 %v287_v34, %v287_v34  ;;  %310 = vrsqrt.f32 %v209_v27 }
  0xae   :  { %v113_v41 = vadd.f32 %v112_v36, %v111_v35  ;;  %v129_v43 = vmul.f32 %v288_v37, %v288_v37  ;;  %312 = vrsqrt.f32 %v226_v31  ;;  %vm196_vm0 = vcmp.eq.f32.partialorder %v193_v23, inf }
  0xaf   :  { %v128_v42 = vadd.f32 %v127_v40, %v126_v39  ;;  %314 = vrsqrt.f32 %v97_v38  ;;  %vm198_vm1 = vcmp.eq.f32.partialorder %v193_v23, 0.0  ;;  %v199_v47 = vand.u32 2147483648, %v193_v23 }
  0xb0   :  { %316 = vrsqrt.f32 %v113_v41  ;;  %vm212_vm2 = vcmp.eq.f32.partialorder %v209_v27, inf  ;;  %vm214_vm3 = vcmp.eq.f32.partialorder %v209_v27, 0.0  ;;  %v215_v48 = vand.u32 2147483648, %v209_v27 }
  0xb1   :  { %v130_v44 = vadd.f32 %v129_v43, %v128_v42  ;;  %vm229_vm4 = vcmp.eq.f32.partialorder %v226_v31, inf  ;;  %vm231_vm5 = vcmp.eq.f32.partialorder %v226_v31, 0.0  ;;  %v232_v51 = vand.u32 2147483648, %v226_v31 }
  0xb2   :  { %vm100_vm6 = vcmp.eq.f32.partialorder %v97_v38, inf  ;;  %vm102_vm7 = vcmp.eq.f32.partialorder %v97_v38, 0.0  ;;  %v103_v55 = vand.u32 2147483648, %v97_v38  ;;  %vm116_vm8 = vcmp.eq.f32.partialorder %v113_v41, inf }
  0xb3   :  { %318 = vrsqrt.f32 %v130_v44  ;;  %vm118_vm9 = vcmp.eq.f32.partialorder %v113_v41, 0.0  ;;  %v119_v58 = vand.u32 2147483648, %v113_v41  ;;  %vm133_vm10 = vcmp.eq.f32.partialorder %v130_v44, inf }
  0xb4   :  { %vm135_vm11 = vcmp.eq.f32.partialorder %v130_v44, 0.0  ;;  %v136_v10 = vand.u32 2147483648, %v130_v44 }
  0xb6   :  { %v309_v45 = vpop.eup %308 }
  0xb7   :  { %v195_v46 = vmul.f32 %v309_v45, %v193_v23  ;;  %v311_v49 = vpop.eup %310 }
  0xb8   :  { %v313_v52 = vpop.eup %312  ;;  %v211_v54 = vmul.f32 %v311_v49, %v209_v27 }
  0xb9   :  { %v197_v50 = vsel %vm196_vm0, %v193_v23, %v195_v46  ;;  %v315_v56 = vpop.eup %314  ;;  %v228_v57 = vmul.f32 %v313_v52, %v226_v31  ;;  %v143_v23 = vpop.permute.xlu0 %142 }
  0xba   :  { %v200_v53 = vsel %vm198_vm1, %v199_v47, %v197_v50  ;;  %v317_v59 = vpop.eup %316  ;;  %v213_v61 = vsel %vm212_vm2, %v209_v27, %v211_v54  ;;  %v99_v62 = vmul.f32 %v315_v56, %v97_v38 }
  0xbb   :  { %v201_v60 = vsub.f32 0.15, %v200_v53  ;;  %v216_v0 = vsel %vm214_vm3, %v215_v48, %v213_v61  ;;  %v230_v1 = vsel %vm229_vm4, %v226_v31, %v228_v57  ;;  %v115_v2 = vmul.f32 %v317_v59, %v113_v41 }
  0xbc   :  { %v217_v3 = vsub.f32 0.1, %v216_v0  ;;  %v233_v4 = vsel %vm231_vm5, %v232_v51, %v230_v1  ;;  %v101_v5 = vsel %vm100_vm6, %v97_v38, %v99_v62 }
  0xbd   :  { %v319_v63 = vpop.eup %318  ;;  %v234_v7 = vsub.f32 0.2, %v233_v4  ;;  %v104_v8 = vsel %vm102_vm7, %v103_v55, %v101_v5  ;;  %v117_v9 = vsel %vm116_vm8, %v113_v41, %v115_v2 }
  0xbe   :  { %v132_v6 = vmul.f32 %v319_v63, %v130_v44  ;;  %v218_v11 = vmax.f32 %v201_v60, %v217_v3  ;;  %v105_v12 = vsub.f32 0.15, %v104_v8  ;;  %v120_v13 = vsel %vm118_vm9, %v119_v58, %v117_v9 }
  0xbf   :  { %v121_v15 = vsub.f32 0.1, %v120_v13 }
  0xc0   :  { %v134_v14 = vsel %vm133_vm10, %v130_v44, %v132_v6  ;;  %v235_v17 = vmax.f32 %v218_v11, %v234_v7 }
  0xc1   :  { %v137_v16 = vsel %vm135_vm11, %v136_v10, %v134_v14  ;;  %v122_v18 = vmax.f32 %v105_v12, %v121_v15 }
  0xc2   :  { %v138_v19 = vsub.f32 0.2, %v137_v16  ;;  %v241_v21 = vadd.f32 %v239_v20, %v235_v17 }
  0xc4   :  { %v139_v22 = vmax.f32 %v122_v18, %v138_v19 }
  0xc6   :  { %v145_v24 = vadd.f32 %v143_v23, %v139_v22 }
  0xc8   :  { %v242_v25 = vmax.f32 %v145_v24, %v241_v21 }
  0xca   :  { %v243_v26 = vmax.f32 %v242_v25, 0.0 }
  0xcc   :  { %v244_v27 = vmin.f32 %v243_v26, 0.2 }
  0xce   :  { %v246_v28 = vsel %vm245_vm12, %v244_v27, 0.0 }
  0xcf   :  { %v247_v29 = vrot.slane %v246_v28, 4 }
  0xd1   :  { %v248_v30 = vadd.f32 %v247_v29, %v246_v28 }
  0xd3   :  { %v249_v31 = vrot.slane %v248_v30, 2 }
  0xd5   :  { %v250_v32 = vadd.f32 %v249_v31, %v248_v30 }
  0xd7   :  { %v251_v33 = vrot.slane %v250_v32, 1 }
  0xd9   :  { %v252_v34 = vadd.f32 %v251_v33, %v250_v32 }
  0xdb   :  { %v253_v35 = vmul.f32 20000.0, %v252_v34 }
  0xdd   :  { %254 = vst [vmem:[#allocation5] sm:$0x1] %v253_v35 }
  0xde   :  { %353 = shalt.err (!%p350_p12)
}
  0xdf   :  { %s354_s8 = scalar_lea.hbm %s480_s3, 16 }
  0xe0   :  { %p355_p13 = scmp.ne.s32.totalorder %s480_s3, %s354_s8  ;;  %p358_p0 = scmp.lt.u32.totalorder %s354_s8, %s480_s3 }
  0xe2   :  { %p360_p1 = pnand %p358_p0, %p355_p13 }
  0xe4   :  { %363 = shalt.err (!%p360_p1)
}
  0xe5   :  { %264 = dma.vmem_to_hbm [thread:$0]  %s262_s4, 16, %s480_s3, [#allocation4]  }
  0xe6   :  { %366 = dma.done.wait [#allocation4], 16  }
  0xe7   :  { %367 = vsyncadd [#allocation4], 4294967280 }
  0xe8   :  { %268 = vsyncpa [#allocation3], 1 }
  0xe9   :  { %269 = vsyncpa [#allocation4], 1 }

</bundles_post_ra>
